<compile_context>
chip_gen: v7x
topology: tpu7x:2x2x1
jax: 0.10.0
libtpu: 0.0.40
codegen_flags: <defaults>
</compile_context>

<pallas_src>
import functools

import jax
import jax.numpy as jnp
from jax.experimental import pallas as pl
from jax.experimental.pallas import tpu as pltpu

LANES = 128
# Minimal sublane multiple for row dims, per element size (dtype packing).
_SUBLANE_MULT = {1: 32, 2: 16, 4: 8}


def _mae_partial_kernel(a_ref, b_ref, out_ref, *, valid_rows, tile_rows, chunk_rows):
    """Write the (8, 128) partial sum of |a - b| for this grid block.

    a_ref, b_ref : VMEM (tile_rows, 128) tiles in the inputs' native dtype
    out_ref      : VMEM (8, 128) f32 partial-sum block (one per grid step)
    valid_rows   : static int -- number of real (in-bounds) rows of the slab
    tile_rows    : static int -- rows per tile (multiple of chunk_rows)
    chunk_rows   : static int -- rows per inner sub-chunk (multiple of 8)
    """
    i = pl.program_id(0)
    nchunks = tile_rows // chunk_rows

    def accumulate(masked):
        def body(c, acc):
            r0 = pl.multiple_of(c * chunk_rows, chunk_rows)
            a = a_ref[pl.ds(r0, chunk_rows), :].astype(jnp.float32)
            b = b_ref[pl.ds(r0, chunk_rows), :].astype(jnp.float32)
            d = jnp.abs(a - b)
            if masked:
                # Zero out rows past the end of the real slab (the ragged last
                # block reads undefined VMEM there).
                row = jax.lax.broadcasted_iota(jnp.int32, d.shape, 0)
                d = jnp.where(i * tile_rows + r0 + row < valid_rows, d, 0.0)
            # Fold (chunk_rows, 128) -> (8, 128): pure cross-vreg VPU adds.
            return acc + d.reshape(chunk_rows // 8, 8, LANES).sum(axis=0)

        acc0 = jnp.zeros((8, LANES), jnp.float32)
        out_ref[...] = jax.lax.fori_loop(0, nchunks, body, acc0, unroll=True)

    if valid_rows % tile_rows == 0:
        # No ragged block anywhere: single unmasked path, no per-step mask ops.
        accumulate(False)
    else:
        last = pl.num_programs(0) - 1

        @pl.when(i != last)
        def _():
            accumulate(False)

        @pl.when(i == last)
        def _():
            accumulate(True)


def mae_loss(recon_imgs, imgs, label_maps=None, mappings=None, *,
             tile_rows=None, chunk_rows=512):
    """Mean Absolute Error loss (matches nn.L1Loss()(recon_imgs, imgs)).

    label_maps / mappings are accepted for signature parity but unused,
    exactly like the reference forward().
    """
    assert recon_imgs.shape == imgs.shape
    n_elems = recon_imgs.size

    a = recon_imgs.reshape(-1)
    b = imgs.reshape(-1)

    itemsize = a.dtype.itemsize
    sub_mult = _SUBLANE_MULT.get(itemsize, 8)

    # Handle a <128-element tail in plain JAX so the main slab is a zero-copy
    # reshape whenever n_elems % 128 == 0 (the common case for image tensors).
    n_main = (n_elems // LANES) * LANES
    tail_sum = None
    if n_main != n_elems:
        ta = a[n_main:].astype(jnp.float32)
        tb = b[n_main:].astype(jnp.float32)
        tail_sum = jnp.sum(jnp.abs(ta - tb))
        a = a[:n_main]
        b = b[:n_main]

    if n_main == 0:
        # Entire input fits in the tail; nothing for the kernel to do.
        return tail_sum / jnp.float32(n_elems)

    rows = n_main // LANES
    a2 = a.reshape(rows, LANES)
    b2 = b.reshape(rows, LANES)

    # Default tile: 4 MiB per operand (8192 f32 rows / 16384 bf16-or-int8 rows).
    if tile_rows is None:
        tile_rows = 8192 if itemsize >= 4 else 16384

    # Inner chunk: multiple of the dtype's sublane packing, <= tile and rows.
    chunk_rows_eff = max(sub_mult,
                         (min(chunk_rows, tile_rows, rows) // sub_mult) * sub_mult)
    # Tile: multiple of the chunk, clamped to the array.
    tile_rows_eff = max(chunk_rows_eff,
                        (min(tile_rows, rows) // chunk_rows_eff) * chunk_rows_eff)
    num_blocks = pl.cdiv(rows, tile_rows_eff)

    # VMEM budget: 2 inputs x 2 pipeline buffers x tile, plus ~3 f32 chunk-sized
    # temporaries (bounded by the inner loop) and slack.  Floor 32 MiB (v5e's
    # default scope is smaller), cap 48 MiB so v7x's 64 MiB VMEM stays safe.
    tile_in_bytes = tile_rows_eff * LANES * itemsize
    temp_bytes = 3 * chunk_rows_eff * LANES * 4
    vmem_limit = int(min(max(4 * tile_in_bytes + temp_bytes + (4 << 20), 32 << 20),
                         48 << 20))

    kernel = functools.partial(
        _mae_partial_kernel,
        valid_rows=rows,
        tile_rows=tile_rows_eff,
        chunk_rows=chunk_rows_eff,
    )

    partials = pl.pallas_call(
        kernel,
        out_shape=jax.ShapeDtypeStruct((num_blocks * 8, LANES), jnp.float32),
        grid=(num_blocks,),
        in_specs=[
            pl.BlockSpec((tile_rows_eff, LANES), lambda i: (i, 0)),
            pl.BlockSpec((tile_rows_eff, LANES), lambda i: (i, 0)),
        ],
        out_specs=pl.BlockSpec((8, LANES), lambda i: (i, 0)),
        compiler_params=pltpu.CompilerParams(
            dimension_semantics=("parallel",),
            vmem_limit_bytes=vmem_limit,
        ),
    )(a2, b2)

    total = jnp.sum(partials)
    if tail_sum is not None:
        total = total + tail_sum
    # n_elems is a static Python int.
    return total / jnp.float32(n_elems)


if __name__ == "__main__":
    key = jax.random.PRNGKey(0)
    k1, k2, k3, k4 = jax.random.split(key, 4)

    # Small image-like batch: (batch, channels, H, W)
    recon_imgs = jax.random.normal(k1, (2, 4, 16, 16), dtype=jnp.float32)
    imgs = jax.random.normal(k2, (2, 4, 16, 16), dtype=jnp.float32)
    # Unused by the loss (parity with the PyTorch signature)
    label_maps = jnp.zeros((2, 1, 16, 16), dtype=jnp.int32)
    mappings = jnp.arange(4, dtype=jnp.int32)

    loss = mae_loss(recon_imgs, imgs, label_maps, mappings)
    loss = jax.block_until_ready(loss)

    ref = jnp.mean(jnp.abs(recon_imgs - imgs))
    assert jnp.allclose(loss, ref, rtol=1e-5, atol=1e-6), (loss, ref)

    # Secondary check: awkward size (n_elems % 128 != 0, rows % 8 != 0)
    # exercising the wrapper tail path and the in-kernel ragged-row mask.
    ra = jax.random.normal(k3, (2, 3, 7, 11), dtype=jnp.float32)
    rb = jax.random.normal(k4, (2, 3, 7, 11), dtype=jnp.float32)
    loss2 = jax.block_until_ready(mae_loss(ra, rb))
    ref2 = jnp.mean(jnp.abs(ra - rb))
    assert jnp.allclose(loss2, ref2, rtol=1e-5, atol=1e-6), (loss2, ref2)

    print("KERNEL_OK")
</pallas_src>

<mosaic_0001>
module attributes {stable_mosaic.version = 11 : i64} {
  func.func @_mae_partial_kernel(%arg0: i32, %arg1: memref<16x128xf32, #tpu.memory_space<vmem>>, %arg2: memref<16x128xf32, #tpu.memory_space<vmem>>, %arg3: memref<8x128xf32, #tpu.memory_space<vmem>>) attributes {dimension_semantics = [#tpu.dimension_semantics<parallel>], iteration_bounds = array<i64: 1>, scalar_prefetch = 0 : i64, scratch_operands = 0 : i64, tpu.core_type = #tpu.core_type<tc>, window_params = [{transform_indices = @transform_0, window_bounds = array<i64: 16, 128>}, {transform_indices = @transform_1, window_bounds = array<i64: 16, 128>}, {transform_indices = @transform_2, window_bounds = array<i64: 8, 128>}]} {
    %cst = arith.constant 0.000000e+00 : f32
    %0 = vector.broadcast %cst : f32 to vector<8x128xf32>
    %c0_i32 = arith.constant 0 : i32
    %c16_i32 = arith.constant 16 : i32
    %1 = arith.muli %c0_i32, %c16_i32 : i32
    %2 = tpu.assume_multiple %1, 16 : i32
    %3 = arith.index_cast %2 : i32 to index
    %c0 = arith.constant 0 : index
    %4 = vector.load %arg1[%3, %c0] : memref<16x128xf32, #tpu.memory_space<vmem>>, vector<16x128xf32>
    %5 = arith.index_cast %2 : i32 to index
    %c0_0 = arith.constant 0 : index
    %6 = vector.load %arg2[%5, %c0_0] : memref<16x128xf32, #tpu.memory_space<vmem>>, vector<16x128xf32>
    %7 = arith.subf %4, %6 : vector<16x128xf32>
    %8 = math.absf %7 : vector<16x128xf32>
    %9 = vector.shape_cast %8 : vector<16x128xf32> to vector<2x8x128xf32>
    %cst_1 = arith.constant dense<0.000000e+00> : vector<8x128xf32>
    %10 = vector.multi_reduction <add>, %9, %cst_1 [0] : vector<2x8x128xf32> to vector<8x128xf32>
    %11 = arith.addf %0, %10 : vector<8x128xf32>
    %c1_i32 = arith.constant 1 : i32
    %c0_2 = arith.constant 0 : index
    %c0_3 = arith.constant 0 : index
    %12 = vector.load %arg3[%c0_2, %c0_3] : memref<8x128xf32, #tpu.memory_space<vmem>>, vector<8x128xf32>
    tpu.vector_store %arg3[%c0_2, %c0_3], %11 {strides = array<i32>} : memref<8x128xf32, #tpu.memory_space<vmem>>, vector<8x128xf32>,
    return
  }
  func.func @transform_0(%arg0: i32) -> (i32, i32) {
    %c0_i32 = arith.constant 0 : i32
    %c0_i32_0 = arith.constant 0 : i32
    return %arg0, %c0_i32 : i32, i32
  }
  func.func @transform_1(%arg0: i32) -> (i32, i32) {
    %c0_i32 = arith.constant 0 : i32
    %c0_i32_0 = arith.constant 0 : i32
    return %arg0, %c0_i32 : i32, i32
  }
  func.func @transform_2(%arg0: i32) -> (i32, i32) {
    %c0_i32 = arith.constant 0 : i32
    %c0_i32_0 = arith.constant 0 : i32
    return %arg0, %c0_i32 : i32, i32
  }
}

</mosaic_0001>

<bundles_post_ra>
// kernel: tpu_custom_call.1
= control target key start
LH: loop header
LB: loop body
LE: loop exit
PB: predicated region body
PF: predicated region fallthrough
CT: control target
= control target key end

     0   :  { %7 = vsyncpa [#allocation3], 0  ;;  %s200_s0 = inlined_call_operand.hbm [shape: f32[16,128], index: 0, kind: input, shape index: {}]   ;;  %s201_s1 = inlined_call_operand.hbm [shape: f32[16,128], index: 1, kind: input, shape index: {}]   ;;  %s202_s2 = inlined_call_operand.hbm [shape: f32[8,128], index: 2, kind: output, shape index: {}]  }
   0x1   :  { %8 = vsyncpa [#allocation6], 0 }
   0x2   :  { %9 = vsyncpa [#allocation4], 0  ;;  %s144_s9 = smov [#allocation2]   ;;  %s72_s13 = scalar_lea.hbm %s200_s0, 256 }
   0x3   :  { %s15_s10 = sshll.u32 %s144_s9, 4  ;;  %p73_p0 = scmp.ne.s32.totalorder %s200_s0, %s72_s13  ;;  %s16_s10 = int_to_ptr.vmem [resolvable:$true] %s15_s10 }
   0x4   :  { %p76_p1 = scmp.lt.u32.totalorder %s72_s13, %s200_s0 }
   0x6   :  { %p78_p2 = pnand %p76_p1, %p73_p0 }
   0x8   :  { %81 = shalt.err (!%p78_p2)
}
   0x9   :  { %s82_s18 = scalar_lea.vmem %s16_s10, 256  ;;  %p87_p4 = scmp.lt.s32.totalorder %s16_s10, %s16_s10 }
   0xa   :  { %p83_p3 = scmp.ne.s32.totalorder %s16_s10, %s82_s18  ;;  %p88_p5 = scmp.lt.s32.totalorder %s82_s18, %s82_s18 }
   0xc   :  { %p89_p6 = por %p88_p5, %p87_p4 }
   0xe   :  { %p90_p7 = pnand %p89_p6, %p83_p3 }
  0x10   :  { %93 = shalt.err (!%p90_p7)
}
  0x11   :  { %s145_s19 = smov 128   ;;  %s146_s20 = smov 8  }
  0x12   :  { %21 = dma.hbm_to_vmem [thread:$0]  %s200_s0, 256, %s16_s10, [#allocation3], %s145_s19, %s145_s19, %s146_s20  }
  0x13   :  { %s147_s23 = smov [#allocation5]   ;;  %s94_s27 = scalar_lea.hbm %s201_s1, 256 }
  0x14   :  { %s27_s24 = sshll.u32 %s147_s23, 4  ;;  %p95_p8 = scmp.ne.s32.totalorder %s201_s1, %s94_s27  ;;  %s28_s24 = int_to_ptr.vmem [resolvable:$true] %s27_s24 }
  0x15   :  { %p98_p9 = scmp.lt.u32.totalorder %s94_s27, %s201_s1 }
  0x17   :  { %p100_p10 = pnand %p98_p9, %p95_p8 }
  0x19   :  { %103 = shalt.err (!%p100_p10)
}
  0x1a   :  { %s104_s4 = scalar_lea.vmem %s28_s24, 256  ;;  %p109_p12 = scmp.lt.s32.totalorder %s28_s24, %s28_s24 }
  0x1b   :  { %p105_p11 = scmp.ne.s32.totalorder %s28_s24, %s104_s4  ;;  %p110_p13 = scmp.lt.s32.totalorder %s104_s4, %s104_s4 }
  0x1d   :  { %p111_p0 = por %p110_p13, %p109_p12 }
  0x1f   :  { %p112_p1 = pnand %p111_p0, %p105_p11 }
  0x21   :  { %115 = shalt.err (!%p112_p1)
}
  0x22   :  { %33 = dma.hbm_to_vmem [thread:$0]  %s201_s1, 256, %s28_s24, [#allocation6], %s145_s19, %s145_s19, %s146_s20  }
  0x23   :  { %138 = dma.done.wait [#allocation3], 256  }
  0x24   :  { %139 = vsyncadd [#allocation3], 4294967040 }
  0x25   :  { %140 = dma.done.wait [#allocation6], 256  }
  0x26   :  { %141 = vsyncadd [#allocation6], 4294967040  ;;  %v40_v0 = vld [vmem:[#allocation2] sm:$0xff]  ;;  %v41_v1 = vld [vmem:[#allocation2 + $0x8] sm:$0xff]  ;;  %s148_s6 = smov [#allocation7]  }
  0x27   :  { %v42_v2 = vld [vmem:[#allocation5] sm:$0xff]  ;;  %v43_v3 = vld [vmem:[#allocation5 + $0x8] sm:$0xff]  ;;  %s57_s7 = sshll.u32 %s148_s6, 4  ;;  %s58_s7 = int_to_ptr.vmem [resolvable:$true] %s57_s7 }
  0x28   :  { %v44_v4 = vsub.f32 %v40_v0, %v42_v2  ;;  %v45_v5 = vsub.f32 %v41_v1, %v43_v3  ;;  %s116_s8 = scalar_lea.vmem %s58_s7, 128  ;;  %p121_p3 = scmp.lt.s32.totalorder %s58_s7, %s58_s7 }
  0x29   :  { %p117_p2 = scmp.ne.s32.totalorder %s58_s7, %s116_s8  ;;  %p122_p4 = scmp.lt.s32.totalorder %s116_s8, %s116_s8 }
  0x2a   :  { %v46_v6 = vand.u32 2147483647, %v44_v4  ;;  %v47_v7 = vand.u32 2147483647, %v45_v5 }
  0x2b   :  { %p123_p5 = por %p122_p4, %p121_p3 }
  0x2c   :  { %v48_v8 = vadd.f32 %v47_v7, %v46_v6 }
  0x2d   :  { %p124_p6 = pnand %p123_p5, %p117_p2 }
  0x2e   :  { %50 = vst [vmem:[#allocation7] sm:$0xff] %v48_v8 }
  0x2f   :  { %127 = shalt.err (!%p124_p6)
}
  0x30   :  { %s128_s10 = scalar_lea.hbm %s202_s2, 128 }
  0x31   :  { %p129_p7 = scmp.ne.s32.totalorder %s202_s2, %s128_s10  ;;  %p132_p8 = scmp.lt.u32.totalorder %s128_s10, %s202_s2 }
  0x33   :  { %p134_p9 = pnand %p132_p8, %p129_p7 }
  0x35   :  { %137 = shalt.err (!%p134_p9)
}
  0x36   :  { %60 = dma.vmem_to_hbm [thread:$0]  %s58_s7, 128, %s202_s2, [#allocation4]  }
  0x37   :  { %142 = dma.done.wait [#allocation4], 128  }
  0x38   :  { %143 = vsyncadd [#allocation4], 4294967168 }
  0x39   :  { %64 = vsyncpa [#allocation3], 1 }
  0x3a   :  { %65 = vsyncpa [#allocation6], 1 }
  0x3b   :  { %66 = vsyncpa [#allocation4], 1 }

</bundles_post_ra>
